<compile_context>
chip_gen: v5e
topology: v5e:2x2
jax: 0.10.0
libtpu: 0.0.40
codegen_flags: <defaults>
</compile_context>

<pallas_src>
import jax
import jax.numpy as jnp
from jax import lax
from jax.experimental import pallas as pl
from jax.experimental.pallas import tpu as pltpu


def rnn_fused_kernel(x_ref, w_ih_ref, b_ih_ref, b_hh_ref, w_hh_ref,
                     w_d_ref, b_d_ref, h0_ref, out_ref, hN_ref):
    """Fused RNNModel forward: input projection + serial recurrence + dense head.

    x_ref:    (T*B, F)   raw inputs, time-major, row t*B + b
    w_ih_ref: (H, F)     W_ih (untransposed)
    b_ih_ref: (1, H)
    b_hh_ref: (1, H)
    w_hh_ref: (H, H)     W_hh (untransposed)
    w_d_ref:  (1, H)     dense weight row (nn.Linear(H, 1).weight)
    b_d_ref:  (1,) SMEM  dense bias (scalar)
    h0_ref:   (1, B, H)  initial hidden state (PyTorch layout)
    out_ref:  (B, 1)     dense(h_T)
    hN_ref:   (1, B, H)  final hidden state (aliased with h0)
    """
    B = h0_ref.shape[1]
    T = x_ref.shape[0] // B

    # --- Input projection, parallel over all T*B rows: one MXU pass. ---
    # x @ W_ih^T via dot_general contracting the feature dim of both operands;
    # no transposed-weight materialization anywhere.  Biases added on the VPU.
    xw = lax.dot_general(
        x_ref[...], w_ih_ref[...],
        dimension_numbers=(((1,), (1,)), ((), ())),
        preferred_element_type=jnp.float32)
    xw = xw + b_ih_ref[...] + b_hh_ref[...]           # (T*B, H), lane-dense

    w_hh = w_hh_ref[...]                              # (H, H), loaded once
    h = h0_ref[0]                                     # (B, H), vreg-resident carry

    # --- Serial recurrence: the only part that cannot parallelize over T. ---
    # T is small & static -> full unroll keeps the whole chain visible to the
    # scheduler.  TODO(synk): switch to lax.fori_loop(..., unroll=True) with
    # pl.ds-indexed slices if T or H grow (vreg pressure / compile time).
    for t in range(T):
        hh = lax.dot_general(
            h, w_hh,
            dimension_numbers=(((1,), (1,)), ((), ())),   # h @ W_hh^T
            preferred_element_type=jnp.float32)
        h = jnp.tanh(xw[t * B:(t + 1) * B, :] + hh)

    # --- Outputs written exactly once, after the loop. ---
    hN_ref[0] = h
    # Dense head as VPU multiply + lane reduce (avoids an MXU pass whose output
    # lane width is 1); SMEM scalar bias.
    out_ref[...] = (jnp.sum(h * w_d_ref[...], axis=-1, keepdims=True)
                    + b_d_ref[0])


def rnn_model_forward(inputs, h0, params):
    """Pallas-backed forward pass of RNNModel.

    inputs: (T, B, F) float32 (seq-first, PyTorch batch_first=False)
    h0:     (1, B, H) float32 (PyTorch RNN state layout) -- donated by caller
    returns (output (B,), state (1, B, H))
    """
    T, B, F = inputs.shape
    H = params["w_hh"].shape[0]

    # Free (bitcast) reshapes only -- no wrapper compute ops.
    x_flat = inputs.reshape(T * B, F)
    b_ih = params["b_ih"].reshape(1, H)
    b_hh = params["b_hh"].reshape(1, H)
    w_d = params["w_d"].reshape(1, H)
    b_d = params["b_d"].reshape(1)

    vmem = pl.BlockSpec(memory_space=pltpu.MemorySpace.VMEM)
    smem = pl.BlockSpec(memory_space=pltpu.MemorySpace.SMEM)

    out, state = pl.pallas_call(
        rnn_fused_kernel,
        out_shape=(
            jax.ShapeDtypeStruct((B, 1), jnp.float32),      # dense(h_T)
            jax.ShapeDtypeStruct((1, B, H), jnp.float32),   # final hidden state
        ),
        # No grid: everything fits VMEM comfortably; single invocation removes
        # all per-grid-step pipeline bookkeeping.
        in_specs=[vmem, vmem, vmem, vmem, vmem, vmem, smem, vmem],
        out_specs=(vmem, vmem),
        # h0 (input 7) buffer is reused in place for the final state (output 1).
        input_output_aliases={7: 1},
    )(x_flat, params["w_ih"], b_ih, b_hh, params["w_hh"], w_d, b_d, h0)

    output = out.reshape(B)               # == .view(inputs.shape[1])
    return output, state


def rnn_model_reference(inputs, h0, params):
    """Pure-JAX reference of the same forward pass (for correctness check)."""
    T, B, F = inputs.shape
    H = params["w_hh"].shape[0]
    h = h0.reshape(B, H)
    for t in range(T):
        h = jnp.tanh(inputs[t] @ params["w_ih"].T + params["b_ih"]
                     + h @ params["w_hh"].T + params["b_hh"])
    out = (h @ params["w_d"].T + params["b_d"]).reshape(B)
    return out, h.reshape(1, B, H)


if __name__ == "__main__":
    # Small shapes consistent with the module: seq=8, batch=2, num_feature=4, hidden=32
    T, B, F, H = 8, 2, 4, 32

    key = jax.random.PRNGKey(0)
    ks = jax.random.split(key, 8)
    scale = 0.1
    params = {
        "w_ih": scale * jax.random.normal(ks[0], (H, F), jnp.float32),
        "b_ih": scale * jax.random.normal(ks[1], (H,), jnp.float32),
        "w_hh": scale * jax.random.normal(ks[2], (H, H), jnp.float32),
        "b_hh": scale * jax.random.normal(ks[3], (H,), jnp.float32),
        "w_d":  scale * jax.random.normal(ks[4], (1, H), jnp.float32),  # nn.Linear(H, 1)
        "b_d":  scale * jax.random.normal(ks[5], (1,), jnp.float32),
    }
    inputs = jax.random.normal(ks[6], (T, B, F), jnp.float32)
    h0 = jax.random.normal(ks[7], (1, B, H), jnp.float32)

    # Compute the pure-JAX reference BEFORE the kernel call: h0 is donated to
    # the jitted forward so its buffer can be reused for the final state.
    ref_out, ref_state = rnn_model_reference(inputs, h0, params)

    forward = jax.jit(rnn_model_forward, donate_argnums=(1,))
    out, state = forward(inputs, h0, params)
    out = jax.block_until_ready(out)
    state = jax.block_until_ready(state)

    assert out.shape == (B,)
    assert state.shape == (1, B, H)
    assert jnp.allclose(out, ref_out, atol=1e-4), "output mismatch"
    assert jnp.allclose(state, ref_state, atol=1e-4), "state mismatch"

    print("KERNEL_OK")
</pallas_src>

<mosaic_0001>
module attributes {stable_mosaic.version = 11 : i64} {
  func.func @rnn_fused_kernel(%arg0: memref<16x4xf32, #tpu.memory_space<vmem>>, %arg1: memref<32x4xf32, #tpu.memory_space<vmem>>, %arg2: memref<1x32xf32, #tpu.memory_space<vmem>>, %arg3: memref<1x32xf32, #tpu.memory_space<vmem>>, %arg4: memref<32x32xf32, #tpu.memory_space<vmem>>, %arg5: memref<1x32xf32, #tpu.memory_space<vmem>>, %arg6: memref<1xf32, #tpu.memory_space<smem>>, %arg7: memref<1x2x32xf32, #tpu.memory_space<vmem>>, %arg8: memref<2x1xf32, #tpu.memory_space<vmem>>, %arg9: memref<1x2x32xf32, #tpu.memory_space<vmem>>) attributes {dimension_semantics = [], scalar_prefetch = 0 : i64, scratch_operands = 0 : i64, tpu.core_type = #tpu.core_type<tc>} {
    %c0 = arith.constant 0 : index
    %c0_0 = arith.constant 0 : index
    %0 = vector.load %arg0[%c0, %c0_0] : memref<16x4xf32, #tpu.memory_space<vmem>>, vector<16x4xf32>
    %c0_1 = arith.constant 0 : index
    %c0_2 = arith.constant 0 : index
    %1 = vector.load %arg1[%c0_1, %c0_2] : memref<32x4xf32, #tpu.memory_space<vmem>>, vector<32x4xf32>
    %cst = arith.constant dense<0.000000e+00> : vector<16x32xf32>
    %2 = tpu.matmul %0, %1, %cst {dimension_numbers = #tpu.dot_dimension_numbers<[1], [1], [0], [0], [0, 0, 1, 0], [], []>} : vector<16x4xf32>, vector<32x4xf32>, vector<16x32xf32> -> vector<16x32xf32>
    %c0_3 = arith.constant 0 : index
    %c0_4 = arith.constant 0 : index
    %3 = vector.load %arg2[%c0_3, %c0_4] : memref<1x32xf32, #tpu.memory_space<vmem>>, vector<1x32xf32>
    %4 = vector.broadcast %3 : vector<1x32xf32> to vector<16x32xf32>
    %5 = arith.addf %2, %4 : vector<16x32xf32>
    %c0_5 = arith.constant 0 : index
    %c0_6 = arith.constant 0 : index
    %6 = vector.load %arg3[%c0_5, %c0_6] : memref<1x32xf32, #tpu.memory_space<vmem>>, vector<1x32xf32>
    %7 = vector.broadcast %6 : vector<1x32xf32> to vector<16x32xf32>
    %8 = arith.addf %5, %7 : vector<16x32xf32>
    %c0_7 = arith.constant 0 : index
    %c0_8 = arith.constant 0 : index
    %9 = vector.load %arg4[%c0_7, %c0_8] : memref<32x32xf32, #tpu.memory_space<vmem>>, vector<32x32xf32>
    %c0_9 = arith.constant 0 : index
    %c0_10 = arith.constant 0 : index
    %c0_11 = arith.constant 0 : index
    %10 = vector.load %arg7[%c0_9, %c0_10, %c0_11] : memref<1x2x32xf32, #tpu.memory_space<vmem>>, vector<1x2x32xf32>
    %11 = vector.shape_cast %10 : vector<1x2x32xf32> to vector<2x32xf32>
    %cst_12 = arith.constant dense<0.000000e+00> : vector<2x32xf32>
    %12 = tpu.matmul %11, %9, %cst_12 {dimension_numbers = #tpu.dot_dimension_numbers<[1], [1], [0], [0], [0, 0, 1, 0], [], []>} : vector<2x32xf32>, vector<32x32xf32>, vector<2x32xf32> -> vector<2x32xf32>
    %13 = vector.extract_strided_slice %8 {offsets = [0, 0], sizes = [2, 32], strides = [1, 1]} : vector<16x32xf32> to vector<2x32xf32>
    %14 = arith.addf %13, %12 : vector<2x32xf32>
    %15 = math.tanh %14 : vector<2x32xf32>
    %cst_13 = arith.constant dense<0.000000e+00> : vector<2x32xf32>
    %16 = tpu.matmul %15, %9, %cst_13 {dimension_numbers = #tpu.dot_dimension_numbers<[1], [1], [0], [0], [0, 0, 1, 0], [], []>} : vector<2x32xf32>, vector<32x32xf32>, vector<2x32xf32> -> vector<2x32xf32>
    %17 = vector.extract_strided_slice %8 {offsets = [2, 0], sizes = [2, 32], strides = [1, 1]} : vector<16x32xf32> to vector<2x32xf32>
    %18 = arith.addf %17, %16 : vector<2x32xf32>
    %19 = math.tanh %18 : vector<2x32xf32>
    %cst_14 = arith.constant dense<0.000000e+00> : vector<2x32xf32>
    %20 = tpu.matmul %19, %9, %cst_14 {dimension_numbers = #tpu.dot_dimension_numbers<[1], [1], [0], [0], [0, 0, 1, 0], [], []>} : vector<2x32xf32>, vector<32x32xf32>, vector<2x32xf32> -> vector<2x32xf32>
    %21 = vector.extract_strided_slice %8 {offsets = [4, 0], sizes = [2, 32], strides = [1, 1]} : vector<16x32xf32> to vector<2x32xf32>
    %22 = arith.addf %21, %20 : vector<2x32xf32>
    %23 = math.tanh %22 : vector<2x32xf32>
    %cst_15 = arith.constant dense<0.000000e+00> : vector<2x32xf32>
    %24 = tpu.matmul %23, %9, %cst_15 {dimension_numbers = #tpu.dot_dimension_numbers<[1], [1], [0], [0], [0, 0, 1, 0], [], []>} : vector<2x32xf32>, vector<32x32xf32>, vector<2x32xf32> -> vector<2x32xf32>
    %25 = vector.extract_strided_slice %8 {offsets = [6, 0], sizes = [2, 32], strides = [1, 1]} : vector<16x32xf32> to vector<2x32xf32>
    %26 = arith.addf %25, %24 : vector<2x32xf32>
    %27 = math.tanh %26 : vector<2x32xf32>
    %cst_16 = arith.constant dense<0.000000e+00> : vector<2x32xf32>
    %28 = tpu.matmul %27, %9, %cst_16 {dimension_numbers = #tpu.dot_dimension_numbers<[1], [1], [0], [0], [0, 0, 1, 0], [], []>} : vector<2x32xf32>, vector<32x32xf32>, vector<2x32xf32> -> vector<2x32xf32>
    %29 = vector.extract_strided_slice %8 {offsets = [8, 0], sizes = [2, 32], strides = [1, 1]} : vector<16x32xf32> to vector<2x32xf32>
    %30 = arith.addf %29, %28 : vector<2x32xf32>
    %31 = math.tanh %30 : vector<2x32xf32>
    %cst_17 = arith.constant dense<0.000000e+00> : vector<2x32xf32>
    %32 = tpu.matmul %31, %9, %cst_17 {dimension_numbers = #tpu.dot_dimension_numbers<[1], [1], [0], [0], [0, 0, 1, 0], [], []>} : vector<2x32xf32>, vector<32x32xf32>, vector<2x32xf32> -> vector<2x32xf32>
    %33 = vector.extract_strided_slice %8 {offsets = [10, 0], sizes = [2, 32], strides = [1, 1]} : vector<16x32xf32> to vector<2x32xf32>
    %34 = arith.addf %33, %32 : vector<2x32xf32>
    %35 = math.tanh %34 : vector<2x32xf32>
    %cst_18 = arith.constant dense<0.000000e+00> : vector<2x32xf32>
    %36 = tpu.matmul %35, %9, %cst_18 {dimension_numbers = #tpu.dot_dimension_numbers<[1], [1], [0], [0], [0, 0, 1, 0], [], []>} : vector<2x32xf32>, vector<32x32xf32>, vector<2x32xf32> -> vector<2x32xf32>
    %37 = vector.extract_strided_slice %8 {offsets = [12, 0], sizes = [2, 32], strides = [1, 1]} : vector<16x32xf32> to vector<2x32xf32>
    %38 = arith.addf %37, %36 : vector<2x32xf32>
    %39 = math.tanh %38 : vector<2x32xf32>
    %cst_19 = arith.constant dense<0.000000e+00> : vector<2x32xf32>
    %40 = tpu.matmul %39, %9, %cst_19 {dimension_numbers = #tpu.dot_dimension_numbers<[1], [1], [0], [0], [0, 0, 1, 0], [], []>} : vector<2x32xf32>, vector<32x32xf32>, vector<2x32xf32> -> vector<2x32xf32>
    %41 = vector.extract_strided_slice %8 {offsets = [14, 0], sizes = [2, 32], strides = [1, 1]} : vector<16x32xf32> to vector<2x32xf32>
    %42 = arith.addf %41, %40 : vector<2x32xf32>
    %43 = math.tanh %42 : vector<2x32xf32>
    %c0_20 = arith.constant 0 : index
    %c0_21 = arith.constant 0 : index
    %c0_22 = arith.constant 0 : index
    %44 = vector.load %arg9[%c0_20, %c0_21, %c0_22] : memref<1x2x32xf32, #tpu.memory_space<vmem>>, vector<1x2x32xf32>
    %45 = vector.shape_cast %44 : vector<1x2x32xf32> to vector<2x32xf32>
    %46 = vector.shape_cast %43 : vector<2x32xf32> to vector<1x2x32xf32>
    tpu.vector_store %arg9[%c0_20, %c0_21, %c0_22], %46 {strides = array<i32>} : memref<1x2x32xf32, #tpu.memory_space<vmem>>, vector<1x2x32xf32>,
    %c0_23 = arith.constant 0 : index
    %c0_24 = arith.constant 0 : index
    %47 = vector.load %arg5[%c0_23, %c0_24] : memref<1x32xf32, #tpu.memory_space<vmem>>, vector<1x32xf32>
    %48 = vector.broadcast %47 : vector<1x32xf32> to vector<2x32xf32>
    %49 = arith.mulf %43, %48 : vector<2x32xf32>
    %cst_25 = arith.constant dense<0.000000e+00> : vector<2xf32>
    %50 = vector.multi_reduction <add>, %49, %cst_25 [1] : vector<2x32xf32> to vector<2xf32>
    %51 = vector.shape_cast %50 : vector<2xf32> to vector<2x1xf32>
    %c0_26 = arith.constant 0 : index
    %52 = memref.load %arg6[%c0_26] : memref<1xf32, #tpu.memory_space<smem>>
    %53 = vector.broadcast %52 : f32 to vector<2x1xf32>
    %54 = arith.addf %51, %53 : vector<2x1xf32>
    %c0_27 = arith.constant 0 : index
    %c0_28 = arith.constant 0 : index
    %55 = vector.load %arg8[%c0_27, %c0_28] : memref<2x1xf32, #tpu.memory_space<vmem>>, vector<2x1xf32>
    tpu.vector_store %arg8[%c0_27, %c0_28], %54 {strides = array<i32>} : memref<2x1xf32, #tpu.memory_space<vmem>>, vector<2x1xf32>,
    return
  }
}

</mosaic_0001>

<bundles_post_ra>
// kernel: rnn_model_forward.1
= control target key start
LH: loop header
LB: loop body
LE: loop exit
PB: predicated region body
PF: predicated region fallthrough
CT: control target
= control target key end

     0   :  { %vm42_vm0 = vcmask 31744   ;;  %vm95_vm1 = vcmask 261120   ;;  %vm331_vm2 = vcmask 261126   ;;  %vm344_vm3 = vcmask 7174   ;;  %s566_s1 = inlined_call_operand.vmem [shape: f32[32,4], index: 1, kind: input, shape index: {}]   ;;  %s567_s4 = inlined_call_operand.vmem [shape: f32[32,32], index: 4, kind: input, shape index: {}]   ;;  %s568_s2 = inlined_call_operand.vmem [shape: f32[1,32], index: 2, kind: input, shape index: {}]   ;;  %s569_s3 = inlined_call_operand.vmem [shape: f32[1,32], index: 3, kind: input, shape index: {}]   ;;  %s570_s0 = inlined_call_operand.vmem [shape: f32[16,4], index: 0, kind: input, shape index: {}]   ;;  %s571_s7 = inlined_call_operand.vmem [shape: f32[1,2,32], index: 7, kind: input, shape index: {}, may-alias: {7,9}]   ;;  %s572_s5 = inlined_call_operand.vmem [shape: f32[1,32], index: 5, kind: input, shape index: {}]   ;;  %s573_s9 = inlined_call_operand.vmem [shape: f32[1,2,32], index: 9, kind: output, shape index: {1}, may-alias: {7,9}]   ;;  %s574_s6 = inlined_call_operand.<no memory space> [shape: f32[1], index: 6, kind: input, shape index: {}]   ;;  %s575_s8 = inlined_call_operand.vmem [shape: f32[2,1], index: 8, kind: output, shape index: {0}]  }
   0x1   :  { %v37_v0 = vld [vmem:[%s566_s1 + $0x18] sm:$0xff]  ;;  %v36_v2 = vld [vmem:[%s566_s1 + $0x10] sm:$0xff]  ;;  %v35_v4 = vld [vmem:[%s566_s1 + $0x8] sm:$0xff]  ;;  %v342_v57 = vstv %s574_s6 }
   0x2   :  { %v93_v1 = vld [vmem:[%s567_s4 + $0x18] sm:$0xff]  ;;  %354 = vmatpush.xpose.msk.msra.mxu0 %vm42_vm0, %v37_v0  ;;  %v92_v3 = vld [vmem:[%s567_s4 + $0x10] sm:$0xff]  ;;  %v91_v5 = vld [vmem:[%s567_s4 + $0x8] sm:$0xff] }
   0x3   :  { %360 = vmatpush.xpose.msk.msra.mxu1 %vm95_vm1, %v93_v1  ;;  %365 = vmatpush.xpose.msk.msra.mxu2 %vm95_vm1, %v93_v1  ;;  %v34_v6 = vld [vmem:[%s566_s1] sm:$0xff]  ;;  %v33_v23 = vld [vmem:[%s570_s0 + $0x8] sm:$0xff] }
   0x4   :  { %370 = vmatpush.xpose.msk.msra.mxu3 %vm95_vm1, %v93_v1  ;;  %v90_v7 = vld [vmem:[%s567_s4] sm:$0xff] }
   0x5   :  { %v32_v8 = vld [vmem:[%s570_s0] sm:$0xff] }
   0x6   :  { %355 = vmatpush.xpose.msk.msra.mxu0 %vm42_vm0, %v36_v2  ;;  %v94_v9 = vld [vmem:[%s571_s7] sm:$0x3] }
   0x7   :  { %361 = vmatpush.xpose.msk.msra.mxu1 %vm95_vm1, %v92_v3  ;;  %366 = vmatpush.xpose.msk.msra.mxu2 %vm95_vm1, %v92_v3  ;;  %v400_v10 = vld [vmem:[%s568_s2] ss:$0 sm:$0xff] }
   0x8   :  { %371 = vmatpush.xpose.msk.msra.mxu3 %vm95_vm1, %v92_v3  ;;  %v401_v11 = vld [vmem:[%s569_s3] ss:$0 sm:$0xff] }
   0x9   :  { %v402_v53 = vld [vmem:[%s572_s5] ss:$0 sm:$0xff] }
   0xa   :  { %356 = vmatpush.xpose.msk.msra.mxu0 %vm42_vm0, %v35_v4 }
   0xb   :  { %362 = vmatpush.xpose.msk.msra.mxu1 %vm95_vm1, %v91_v5  ;;  %367 = vmatpush.xpose.msk.msra.mxu2 %vm95_vm1, %v91_v5 }
   0xc   :  { %372 = vmatpush.xpose.msk.msra.mxu3 %vm95_vm1, %v91_v5 }
   0xe   :  { %357 = vmatpush.xpose.msk.msra.mxu0 %vm42_vm0, %v34_v6 }
   0xf   :  { %363 = vmatpush.xpose.msk.msra.mxu1 %vm95_vm1, %v90_v7  ;;  %368 = vmatpush.xpose.msk.msra.mxu2 %vm95_vm1, %v90_v7 }
  0x10   :  { %373 = vmatpush.xpose.msk.msra.mxu3 %vm95_vm1, %v90_v7 }
  0x11   :  { %358 = vmatmul.msk.f32.vlgmr.msra.gmra.mxu0 %vm42_vm0, %v32_v8 }
  0x12   :  { %375 = vmatpush.xpose.msk.msrb.mxu0 %vm95_vm1, %v93_v1  ;;  %364 = vmatmul.msk.f32.vlgmr.msra.gmra.mxu1 %vm95_vm1, %v94_v9 }
  0x13   :  { %380 = vmatpush.xpose.msk.msrb.mxu1 %vm95_vm1, %v93_v1  ;;  %385 = vmatpush.xpose.msk.msrb.mxu2 %vm95_vm1, %v93_v1 }
  0x14   :  { %390 = vmatpush.xpose.msk.msrb.mxu3 %vm95_vm1, %v93_v1 }
  0x16   :  { %376 = vmatpush.xpose.msk.msrb.mxu0 %vm95_vm1, %v92_v3 }
  0x17   :  { %381 = vmatpush.xpose.msk.msrb.mxu1 %vm95_vm1, %v92_v3  ;;  %386 = vmatpush.xpose.msk.msrb.mxu2 %vm95_vm1, %v92_v3 }
  0x18   :  { %391 = vmatpush.xpose.msk.msrb.mxu3 %vm95_vm1, %v92_v3 }
  0x19   :  { %359 = vmatmul.msk.f32.gmra.mxu0 %vm42_vm0, %v33_v23 }
  0x1a   :  { %377 = vmatpush.xpose.msk.msrb.mxu0 %vm95_vm1, %v91_v5 }
  0x1b   :  { %382 = vmatpush.xpose.msk.msrb.mxu1 %vm95_vm1, %v91_v5  ;;  %387 = vmatpush.xpose.msk.msrb.mxu2 %vm95_vm1, %v91_v5 }
  0x1c   :  { %392 = vmatpush.xpose.msk.msrb.mxu3 %vm95_vm1, %v91_v5 }
  0x1e   :  { %378 = vmatpush.xpose.msk.msrb.mxu0 %vm95_vm1, %v90_v7 }
  0x1f   :  { %383 = vmatpush.xpose.msk.msrb.mxu1 %vm95_vm1, %v90_v7  ;;  %388 = vmatpush.xpose.msk.msrb.mxu2 %vm95_vm1, %v90_v7 }
  0x20   :  { %393 = vmatpush.xpose.msk.msrb.mxu3 %vm95_vm1, %v90_v7 }
  0x22   :  { %395 = vmatpush.xpose.msk.msra.mxu0 %vm95_vm1, %v93_v1 }
  0x26   :  { %396 = vmatpush.xpose.msk.msra.mxu0 %vm95_vm1, %v92_v3 }
  0x2a   :  { %397 = vmatpush.xpose.msk.msra.mxu0 %vm95_vm1, %v91_v5 }
  0x2e   :  { %398 = vmatpush.xpose.msk.msra.mxu0 %vm95_vm1, %v90_v7 }
  0x8e   :  { %v78_v12 = vpop.f32.mrf.mxu0 }
  0x8f   :  { %v79_v13 = vadd.f32 %v400_v10, %v78_v12  ;;  %v128_v14 = vpop.f32.mrf.mxu1 }
  0x91   :  { %v88_v15 = vadd.f32 %v401_v11, %v79_v13 }
  0x93   :  { %v131_v16 = vadd.f32 %v128_v14, %v88_v15 }
  0x95   :  { %403 = vtanh.f32 %v131_v16 }
  0x96   :  { %v81_v29 = vpop.f32.mrf.mxu0 }
  0x97   :  { %v82_v35 = vadd.f32 %v400_v10, %v81_v29 }
  0x99   :  { %v89_v36 = vadd.f32 %v401_v11, %v82_v35 }
  0x9b   :  { %v404_v17 = vpop.eup %403 }
  0x9c   :  { %369 = vmatmul.msk.f32.vlgmr.msra.gmra.mxu2 %vm95_vm1, %v404_v17 }
 0x11f   :  { %v153_v18 = vpop.f32.mrf.mxu2 }
 0x120   :  { %v157_v19 = vrot.slane %v153_v18, 6 }
 0x122   :  { %v159_v20 = vadd.f32 %v157_v19, %v88_v15 }
 0x124   :  { %405 = vtanh.f32 %v159_v20 }
 0x12a   :  { %v406_v21 = vpop.eup %405 }
 0x12b   :  { %v162_v22 = vrot.slane %v406_v21, 2 }
 0x12d   :  { %374 = vmatmul.msk.f32.vlgmr.msra.gmra.mxu3 %vm95_vm1, %v162_v22 }
 0x1b0   :  { %v182_v24 = vpop.f32.mrf.mxu3 }
 0x1b1   :  { %v186_v25 = vrot.slane %v182_v24, 4 }
 0x1b3   :  { %v188_v26 = vadd.f32 %v186_v25, %v88_v15 }
 0x1b5   :  { %407 = vtanh.f32 %v188_v26 }
 0x1bb   :  { %v408_v27 = vpop.eup %407 }
 0x1bc   :  { %v191_v28 = vrot.slane %v408_v27, 4 }
 0x1be   :  { %379 = vmatmul.msk.f32.vlgmr.msrb.gmra.mxu0 %vm95_vm1, %v191_v28 }
 0x23b   :  { %v211_v30 = vpop.f32.mrf.mxu0 }
 0x23c   :  { %v215_v31 = vrot.slane %v211_v30, 2 }
 0x23e   :  { %v217_v32 = vadd.f32 %v215_v31, %v88_v15 }
 0x240   :  { %409 = vtanh.f32 %v217_v32 }
 0x246   :  { %v410_v33 = vpop.eup %409 }
 0x247   :  { %v220_v34 = vrot.slane %v410_v33, 6 }
 0x249   :  { %384 = vmatmul.msk.f32.vlgmr.msrb.gmra.mxu1 %vm95_vm1, %v220_v34 }
 0x2c6   :  { %v240_v37 = vpop.f32.mrf.mxu1 }
 0x2c7   :  { %v243_v38 = vadd.f32 %v240_v37, %v89_v36 }
 0x2c9   :  { %411 = vtanh.f32 %v243_v38 }
 0x2cf   :  { %v412_v39 = vpop.eup %411 }
 0x2d0   :  { %389 = vmatmul.msk.f32.vlgmr.msrb.gmra.mxu2 %vm95_vm1, %v412_v39 }
 0x353   :  { %v265_v40 = vpop.f32.mrf.mxu2 }
 0x354   :  { %v269_v41 = vrot.slane %v265_v40, 6 }
 0x356   :  { %v271_v42 = vadd.f32 %v269_v41, %v89_v36 }
 0x358   :  { %413 = vtanh.f32 %v271_v42 }
 0x35e   :  { %v414_v43 = vpop.eup %413 }
 0x35f   :  { %v274_v44 = vrot.slane %v414_v43, 2 }
 0x361   :  { %394 = vmatmul.msk.f32.vlgmr.msrb.gmra.mxu3 %vm95_vm1, %v274_v44 }
 0x3e4   :  { %v294_v45 = vpop.f32.mrf.mxu3 }
 0x3e5   :  { %v298_v46 = vrot.slane %v294_v45, 4 }
 0x3e7   :  { %v300_v47 = vadd.f32 %v298_v46, %v89_v36 }
 0x3e9   :  { %415 = vtanh.f32 %v300_v47 }
 0x3ef   :  { %v416_v48 = vpop.eup %415 }
 0x3f0   :  { %v303_v49 = vrot.slane %v416_v48, 4 }
 0x3f2   :  { %399 = vmatmul.msk.f32.vlgmr.msra.gmra.mxu0 %vm95_vm1, %v303_v49 }
 0x46f   :  { %v323_v50 = vpop.f32.mrf.mxu0 }
 0x470   :  { %v327_v51 = vrot.slane %v323_v50, 2 }
 0x472   :  { %v329_v52 = vadd.f32 %v327_v51, %v89_v36 }
 0x474   :  { %417 = vtanh.f32 %v329_v52 }
 0x47a   :  { %v418_v54 = vpop.eup %417 }
 0x47b   :  { %332 = vst.msk [vmem:[%s573_s9 - $0x6] sm:$0xc0] %vm331_vm2, %v418_v54  ;;  %v337_v55 = vmul.f32 %v418_v54, %v402_v53 }
 0x47d   :  { %v338_v56 = vsel %vm331_vm2, %v337_v55, 0.0 }
 0x47e   :  { %339 = vadd.xlane.f32.xlu0 %v338_v56 }
 0x4f1   :  { %v340_v58 = vpop.xlane.xlu0 %339 }
 0x4f2   :  { %v343_v59 = vadd.f32 %v342_v57, %v340_v58 }
 0x4f4   :  { %345 = vst.msk [vmem:[%s575_s8 - $0x6] sm:$0xc0] %vm344_vm3, %v343_v59 }

</bundles_post_ra>
